<compile_context>
chip_gen: v7x
topology: tpu7x:2x2x1
jax: 0.10.0
libtpu: 0.0.40
codegen_flags: <defaults>
</compile_context>

<pallas_src>
import functools

import jax
import jax.numpy as jnp
from jax.experimental import pallas as pl
from jax.experimental.pallas import tpu as pltpu


def _round_up(x, m):
    return (x + m - 1) // m * m


def _align_kernel(d_ref, q_ref, qpt_ref, qmask_ref, wt_ref, b_ref,
                  out_ref, alpha_ref):
    # d_ref:     (Td, Ep)   document tile for this (batch, tile) step, bf16
    # q_ref:     (Lqp, Ep)  raw (padded) question embeddings, bf16
    # qpt_ref:   (Ep, Lqp)  precomputed relu(q @ W^T + b), transposed, bf16
    # qmask_ref: (1, Lqp)   int32, nonzero = padding
    # wt_ref:    (Ep, Ep)   W^T of the shared linear layer, bf16
    # b_ref:     (1, Ep)    bias, f32
    # out_ref:   (Td, Ep)   aligned feature tile, f32
    # alpha_ref: (Td, Lqp)  attention weights tile, f32

    # Shared linear projection + ReLU on the document tile (bf16 MXU, f32 acc).
    d_proj = jnp.dot(d_ref[...], wt_ref[...],
                     preferred_element_type=jnp.float32)            # (Td, Ep)
    d_proj = jnp.maximum(d_proj + b_ref[...], 0.0).astype(jnp.bfloat16)

    # scores = d_proj @ q_proj^T — q_proj arrives pre-transposed, so this is a
    # plain NN matmul on the MXU (no per-tile XLU transpose).
    scores = jnp.dot(d_proj, qpt_ref[...],
                     preferred_element_type=jnp.float32)            # (Td, Lqp)

    # masked_fill_(q_mask, -inf); padded question columns are masked too.
    scores = jnp.where(qmask_ref[...] != 0, -jnp.inf, scores)

    # Softmax over the question axis (f32 math; reciprocal on the EUP slot).
    s_max = jnp.max(scores, axis=-1, keepdims=True)
    p = jnp.exp(scores - s_max)
    denom = jnp.sum(p, axis=-1, keepdims=True)
    alpha = p * pl.reciprocal(denom, approx=True)                   # (Td, Lqp)

    # align_feature = alpha @ q_embedding (raw q embeddings, not q_proj).
    align = jnp.dot(alpha.astype(jnp.bfloat16), q_ref[...],
                    preferred_element_type=jnp.float32)             # (Td, Ep)

    alpha_ref[...] = alpha.astype(alpha_ref.dtype)
    out_ref[...] = align.astype(out_ref.dtype)


@functools.partial(jax.jit, static_argnames=("tile_ld",))
def align_feature_layer(d_embedding, q_embedding, q_mask, weight, bias,
                        tile_ld=512):
    """
    d_embedding: (B, Ld, E) float32/bfloat16
    q_embedding: (B, Lq, E) float32/bfloat16
    q_mask:      (B, Lq)    int/bool (1 = padding, 0 = token)
    weight:      (E, E)     nn.Linear weight (out_features, in_features)
    bias:        (E,)       nn.Linear bias
    returns (align_feature (B, Ld, E), alpha (B, Ld, Lq)), both float32
    """
    B, Ld, E = d_embedding.shape
    _, Lq, _ = q_embedding.shape

    bf16, f32 = jnp.bfloat16, jnp.float32

    # Lane-dense padding: lane dims -> multiples of 128; bf16 sublane -> 16.
    Ep = _round_up(E, 128)
    Lqp = _round_up(Lq, 128)
    td = min(tile_ld, _round_up(Ld, 16))
    Ldp = _round_up(Ld, td)
    n_tiles = Ldp // td

    # bf16 inputs; only emit pads that are actually needed (pad elision).
    d_p = d_embedding.astype(bf16)
    if Ldp != Ld or Ep != E:
        d_p = jnp.pad(d_p, ((0, 0), (0, Ldp - Ld), (0, Ep - E)))
    q_p = q_embedding.astype(bf16)
    if Lqp != Lq or Ep != E:
        q_p = jnp.pad(q_p, ((0, 0), (0, Lqp - Lq), (0, Ep - E)))
    # Padded question positions are marked as padding (1) so they get masked.
    m_p = q_mask.astype(jnp.int32)
    if Lqp != Lq:
        m_p = jnp.pad(m_p, ((0, 0), (0, Lqp - Lq)), constant_values=1)
    m_p = m_p.reshape(B, 1, Lqp)
    wt_p = weight.T.astype(bf16)
    if Ep != E:
        wt_p = jnp.pad(wt_p, ((0, Ep - E), (0, Ep - E)))
    b_p = bias.astype(f32)
    if Ep != E:
        b_p = jnp.pad(b_p, (0, Ep - E))
    b_p = b_p.reshape(1, Ep)

    # Precompute q_proj = relu(q @ W^T + b) once per batch in XLA (tiny matmul
    # over (B, Lqp, Ep)), pre-transposed so the in-kernel scores matmul is NN.
    q_proj = jnp.maximum(
        jnp.einsum("bqe,ef->bqf", q_p, wt_p,
                   preferred_element_type=f32) + b_p, 0.0)
    qpt_p = jnp.swapaxes(q_proj, 1, 2).astype(bf16)                 # (B, Ep, Lqp)

    out_shape = (
        jax.ShapeDtypeStruct((B, Ldp, Ep), f32),       # align_feature (padded)
        jax.ShapeDtypeStruct((B, Ldp, Lqp), f32),      # alpha (padded)
    )

    grid_spec = pltpu.PrefetchScalarGridSpec(
        num_scalar_prefetch=0,
        grid=(B, n_tiles),
        in_specs=[
            pl.BlockSpec((None, td, Ep), lambda b, i: (b, i, 0)),    # d tile
            pl.BlockSpec((None, Lqp, Ep), lambda b, i: (b, 0, 0)),   # q (raw)
            pl.BlockSpec((None, Ep, Lqp), lambda b, i: (b, 0, 0)),   # q_proj^T
            pl.BlockSpec((None, 1, Lqp), lambda b, i: (b, 0, 0)),    # q_mask
            pl.BlockSpec((Ep, Ep), lambda b, i: (0, 0)),             # W^T
            pl.BlockSpec((1, Ep), lambda b, i: (0, 0)),              # bias
        ],
        out_specs=[
            pl.BlockSpec((None, td, Ep), lambda b, i: (b, i, 0)),    # align
            pl.BlockSpec((None, td, Lqp), lambda b, i: (b, i, 0)),   # alpha
        ],
    )

    # Double-buffered per-step VMEM footprint -> explicit scoped-VMEM limit
    # (capped at 64 MiB so it is valid on every generation incl. v7x).
    est_vmem = (
        2 * td * Ep * 2            # d tile (bf16)
        + 2 * Lqp * Ep * 2         # q (bf16)
        + 2 * Ep * Lqp * 2         # q_proj^T (bf16)
        + 2 * Lqp * 4              # q_mask (i32)
        + 2 * Ep * Ep * 2          # W^T (bf16)
        + 2 * Ep * 4               # bias (f32)
        + 2 * td * Ep * 4          # align out (f32)
        + 2 * td * Lqp * 4         # alpha out (f32)
    )
    vmem_limit = int(min(max(32 << 20, est_vmem * 3 // 2), 64 << 20))

    align_p, alpha_p = pl.pallas_call(
        _align_kernel,
        out_shape=out_shape,
        grid_spec=grid_spec,
        # No cross-tile state anymore (q_proj is precomputed), so both grid
        # axes can shard across TensorCores.
        compiler_params=pltpu.CompilerParams(
            dimension_semantics=("parallel", "parallel"),
            vmem_limit_bytes=vmem_limit),
    )(d_p, q_p, qpt_p, m_p, wt_p, b_p)

    # Slice elision: only strip padding that was actually added.
    if Ldp != Ld or Ep != E:
        align_p = align_p[:, :Ld, :E]
    if Ldp != Ld or Lqp != Lq:
        alpha_p = alpha_p[:, :Ld, :Lq]
    return align_p, alpha_p


def _reference_f32(d_embedding, q_embedding, q_mask, weight, bias):
    """Pure-JAX f32 reference reproducing the PyTorch forward exactly."""
    d_proj = jax.nn.relu(jnp.einsum("bld,ed->ble", d_embedding, weight) + bias)
    q_proj = jax.nn.relu(jnp.einsum("bld,ed->ble", q_embedding, weight) + bias)
    scores = jnp.einsum("bde,bqe->bdq", d_proj, q_proj)
    scores = jnp.where(q_mask[:, None, :] != 0, -jnp.inf, scores)
    alpha = jax.nn.softmax(scores, axis=-1)
    align = jnp.einsum("bdq,bqe->bde", alpha, q_embedding)
    return align, alpha


def _reference_bf16_matched(d_embedding, q_embedding, q_mask, weight, bias):
    """Reference matching the kernel's precision choices (bf16 MXU inputs,
    f32 accumulation), used for a tight numerical check."""
    bf16 = jnp.bfloat16
    wt = weight.T.astype(bf16)
    d_proj = jnp.maximum(
        jnp.einsum("bld,de->ble", d_embedding.astype(bf16), wt,
                   preferred_element_type=jnp.float32) + bias, 0.0).astype(bf16)
    q_proj = jnp.maximum(
        jnp.einsum("bld,de->ble", q_embedding.astype(bf16), wt,
                   preferred_element_type=jnp.float32) + bias, 0.0).astype(bf16)
    scores = jnp.einsum("bde,bqe->bdq", d_proj, q_proj,
                        preferred_element_type=jnp.float32)
    scores = jnp.where(q_mask[:, None, :] != 0, -jnp.inf, scores)
    alpha = jax.nn.softmax(scores, axis=-1)
    align = jnp.einsum("bdq,bqe->bde", alpha.astype(bf16),
                       q_embedding.astype(bf16),
                       preferred_element_type=jnp.float32)
    return align, alpha


if __name__ == "__main__":
    # Small shapes consistent with the module's forward.
    B, Ld, Lq, E = 2, 16, 8, 32

    key = jax.random.PRNGKey(0)
    k_d, k_q, k_w, k_b = jax.random.split(key, 4)

    d_embedding = jax.random.normal(k_d, (B, Ld, E), dtype=jnp.float32)
    q_embedding = jax.random.normal(k_q, (B, Lq, E), dtype=jnp.float32)

    # Deterministic parameter init (nn.Linear(input_size, input_size) shapes).
    weight = jax.random.normal(k_w, (E, E), dtype=jnp.float32) * (1.0 / jnp.sqrt(E))
    bias = jax.random.normal(k_b, (E,), dtype=jnp.float32) * 0.01

    # q_mask: 1 for padding, 0 for real tokens; pad the tail of each question.
    q_lens = jnp.array([6, 4], dtype=jnp.int32)
    q_mask = (jnp.arange(Lq)[None, :] >= q_lens[:, None]).astype(jnp.int32)

    align, alpha = align_feature_layer(d_embedding, q_embedding, q_mask,
                                       weight, bias)
    align = jax.block_until_ready(align)
    alpha = jax.block_until_ready(alpha)

    # Tight check against the precision-matched (bf16 matmul) reference.
    m_align, m_alpha = _reference_bf16_matched(d_embedding, q_embedding,
                                               q_mask, weight, bias)
    assert jnp.allclose(align, m_align, atol=2e-2, rtol=2e-2)
    assert jnp.allclose(alpha, m_alpha, atol=2e-2, rtol=2e-2)

    # Looser semantic check against the exact f32 module reference.
    r_align, r_alpha = _reference_f32(d_embedding, q_embedding, q_mask,
                                      weight, bias)
    assert jnp.allclose(align, r_align, atol=1e-1, rtol=1e-1)
    assert jnp.allclose(alpha, r_alpha, atol=1e-1, rtol=1e-1)

    # Structural sanity: softmax rows normalize, masked columns are exactly 0.
    assert jnp.allclose(alpha.sum(axis=-1), 1.0, atol=2e-2)
    assert float(jnp.max(jnp.abs(alpha * q_mask[:, None, :]))) <= 1e-6

    print("KERNEL_OK")
</pallas_src>

<mosaic_0001>
module attributes {stable_mosaic.version = 11 : i64} {
  func.func @_align_kernel(%arg0: i32, %arg1: i32, %arg2: memref<1x16x128xbf16, #tpu.memory_space<vmem>>, %arg3: memref<1x128x128xbf16, #tpu.memory_space<vmem>>, %arg4: memref<1x128x128xbf16, #tpu.memory_space<vmem>>, %arg5: memref<1x1x128xi32, #tpu.memory_space<vmem>>, %arg6: memref<128x128xbf16, #tpu.memory_space<vmem>>, %arg7: memref<1x128xf32, #tpu.memory_space<vmem>>, %arg8: memref<1x16x128xf32, #tpu.memory_space<vmem>>, %arg9: memref<1x16x128xf32, #tpu.memory_space<vmem>>) attributes {dimension_semantics = [#tpu.dimension_semantics<parallel>, #tpu.dimension_semantics<parallel>], iteration_bounds = array<i64: 2, 1>, scalar_prefetch = 0 : i64, scratch_operands = 0 : i64, tpu.core_type = #tpu.core_type<tc>, window_params = [{transform_indices = @transform_0, window_bounds = array<i64: 1, 16, 128>}, {transform_indices = @transform_1, window_bounds = array<i64: 1, 128, 128>}, {transform_indices = @transform_2, window_bounds = array<i64: 1, 128, 128>}, {transform_indices = @transform_3, window_bounds = array<i64: 1, 1, 128>}, {pipeline_mode = #tpu.pipeline_mode<synchronous>, transform_indices = @transform_4, window_bounds = array<i64: 128, 128>}, {pipeline_mode = #tpu.pipeline_mode<synchronous>, transform_indices = @transform_5, window_bounds = array<i64: 1, 128>}, {transform_indices = @transform_6, window_bounds = array<i64: 1, 16, 128>}, {transform_indices = @transform_7, window_bounds = array<i64: 1, 16, 128>}]} {
    %c0 = arith.constant 0 : index
    %c0_0 = arith.constant 0 : index
    %c0_1 = arith.constant 0 : index
    %0 = vector.load %arg2[%c0, %c0_0, %c0_1] : memref<1x16x128xbf16, #tpu.memory_space<vmem>>, vector<1x16x128xbf16>
    %1 = vector.shape_cast %0 : vector<1x16x128xbf16> to vector<16x128xbf16>
    %c0_2 = arith.constant 0 : index
    %c0_3 = arith.constant 0 : index
    %2 = vector.load %arg6[%c0_2, %c0_3] : memref<128x128xbf16, #tpu.memory_space<vmem>>, vector<128x128xbf16>
    %cst = arith.constant dense<0.000000e+00> : vector<16x128xf32>
    %3 = tpu.matmul %1, %2, %cst {dimension_numbers = #tpu.dot_dimension_numbers<[1], [0], [0], [1], [0, 0, 1, 1], [], []>} : vector<16x128xbf16>, vector<128x128xbf16>, vector<16x128xf32> -> vector<16x128xf32>
    %c0_4 = arith.constant 0 : index
    %c0_5 = arith.constant 0 : index
    %4 = vector.load %arg7[%c0_4, %c0_5] : memref<1x128xf32, #tpu.memory_space<vmem>>, vector<1x128xf32>
    %5 = vector.broadcast %4 : vector<1x128xf32> to vector<16x128xf32>
    %6 = arith.addf %3, %5 : vector<16x128xf32>
    %cst_6 = arith.constant 0.000000e+00 : f32
    %7 = vector.broadcast %cst_6 : f32 to vector<16x128xf32>
    %8 = arith.maximumf %6, %7 : vector<16x128xf32>
    %9 = arith.truncf %8 : vector<16x128xf32> to vector<16x128xbf16>
    %c0_7 = arith.constant 0 : index
    %c0_8 = arith.constant 0 : index
    %c0_9 = arith.constant 0 : index
    %10 = vector.load %arg4[%c0_7, %c0_8, %c0_9] : memref<1x128x128xbf16, #tpu.memory_space<vmem>>, vector<1x128x128xbf16>
    %11 = vector.shape_cast %10 : vector<1x128x128xbf16> to vector<128x128xbf16>
    %cst_10 = arith.constant dense<0.000000e+00> : vector<16x128xf32>
    %12 = tpu.matmul %9, %11, %cst_10 {dimension_numbers = #tpu.dot_dimension_numbers<[1], [0], [0], [1], [0, 0, 1, 1], [], []>} : vector<16x128xbf16>, vector<128x128xbf16>, vector<16x128xf32> -> vector<16x128xf32>
    %c0_11 = arith.constant 0 : index
    %c0_12 = arith.constant 0 : index
    %c0_13 = arith.constant 0 : index
    %13 = vector.load %arg5[%c0_11, %c0_12, %c0_13] : memref<1x1x128xi32, #tpu.memory_space<vmem>>, vector<1x1x128xi32>
    %14 = vector.shape_cast %13 : vector<1x1x128xi32> to vector<1x128xi32>
    %c0_i32 = arith.constant 0 : i32
    %15 = vector.broadcast %c0_i32 : i32 to vector<1x128xi32>
    %16 = arith.cmpi ne, %14, %15 : vector<1x128xi32>
    %cst_14 = arith.constant 0xFF800000 : f32
    %17 = vector.shape_cast %16 : vector<1x128xi1> to vector<1x128xi1>
    %18 = vector.broadcast %17 : vector<1x128xi1> to vector<16x128xi1>
    %19 = vector.broadcast %cst_14 : f32 to vector<16x128xf32>
    %20 = arith.select %18, %19, %12 : vector<16x128xi1>, vector<16x128xf32>
    %cst_15 = arith.constant dense<0xFF800000> : vector<16xf32>
    %21 = vector.multi_reduction <maximumf>, %20, %cst_15 [1] : vector<16x128xf32> to vector<16xf32>
    %22 = vector.shape_cast %21 : vector<16xf32> to vector<16x1xf32>
    %23 = vector.broadcast %22 : vector<16x1xf32> to vector<16x128xf32>
    %24 = arith.subf %20, %23 : vector<16x128xf32>
    %25 = math.exp %24 : vector<16x128xf32>
    %cst_16 = arith.constant dense<0.000000e+00> : vector<16xf32>
    %26 = vector.multi_reduction <add>, %25, %cst_16 [1] : vector<16x128xf32> to vector<16xf32>
    %27 = vector.shape_cast %26 : vector<16xf32> to vector<16x1xf32>
    %28 = tpu.reciprocal %27 {approx = true} : vector<16x1xf32> -> vector<16x1xf32>
    %29 = vector.broadcast %28 : vector<16x1xf32> to vector<16x128xf32>
    %30 = arith.mulf %25, %29 : vector<16x128xf32>
    %31 = arith.truncf %30 : vector<16x128xf32> to vector<16x128xbf16>
    %c0_17 = arith.constant 0 : index
    %c0_18 = arith.constant 0 : index
    %c0_19 = arith.constant 0 : index
    %32 = vector.load %arg3[%c0_17, %c0_18, %c0_19] : memref<1x128x128xbf16, #tpu.memory_space<vmem>>, vector<1x128x128xbf16>
    %33 = vector.shape_cast %32 : vector<1x128x128xbf16> to vector<128x128xbf16>
    %cst_20 = arith.constant dense<0.000000e+00> : vector<16x128xf32>
    %34 = tpu.matmul %31, %33, %cst_20 {dimension_numbers = #tpu.dot_dimension_numbers<[1], [0], [0], [1], [0, 0, 1, 1], [], []>} : vector<16x128xbf16>, vector<128x128xbf16>, vector<16x128xf32> -> vector<16x128xf32>
    %c0_21 = arith.constant 0 : index
    %c0_22 = arith.constant 0 : index
    %c0_23 = arith.constant 0 : index
    %35 = vector.load %arg9[%c0_21, %c0_22, %c0_23] : memref<1x16x128xf32, #tpu.memory_space<vmem>>, vector<1x16x128xf32>
    %36 = vector.shape_cast %35 : vector<1x16x128xf32> to vector<16x128xf32>
    %37 = vector.shape_cast %30 : vector<16x128xf32> to vector<1x16x128xf32>
    tpu.vector_store %arg9[%c0_21, %c0_22, %c0_23], %37 {strides = array<i32>} : memref<1x16x128xf32, #tpu.memory_space<vmem>>, vector<1x16x128xf32>,
    %c0_24 = arith.constant 0 : index
    %c0_25 = arith.constant 0 : index
    %c0_26 = arith.constant 0 : index
    %38 = vector.load %arg8[%c0_24, %c0_25, %c0_26] : memref<1x16x128xf32, #tpu.memory_space<vmem>>, vector<1x16x128xf32>
    %39 = vector.shape_cast %38 : vector<1x16x128xf32> to vector<16x128xf32>
    %40 = vector.shape_cast %34 : vector<16x128xf32> to vector<1x16x128xf32>
    tpu.vector_store %arg8[%c0_24, %c0_25, %c0_26], %40 {strides = array<i32>} : memref<1x16x128xf32, #tpu.memory_space<vmem>>, vector<1x16x128xf32>,
    return
  }
  func.func @transform_0(%arg0: i32, %arg1: i32) -> (i32, i32, i32) {
    %c0_i32 = arith.constant 0 : i32
    %c0_i32_0 = arith.constant 0 : i32
    return %arg0, %arg1, %c0_i32 : i32, i32, i32
  }
  func.func @transform_1(%arg0: i32, %arg1: i32) -> (i32, i32, i32) {
    %c0_i32 = arith.constant 0 : i32
    %c0_i32_0 = arith.constant 0 : i32
    %c0_i32_1 = arith.constant 0 : i32
    return %arg0, %c0_i32, %c0_i32_0 : i32, i32, i32
  }
  func.func @transform_2(%arg0: i32, %arg1: i32) -> (i32, i32, i32) {
    %c0_i32 = arith.constant 0 : i32
    %c0_i32_0 = arith.constant 0 : i32
    %c0_i32_1 = arith.constant 0 : i32
    return %arg0, %c0_i32, %c0_i32_0 : i32, i32, i32
  }
  func.func @transform_3(%arg0: i32, %arg1: i32) -> (i32, i32, i32) {
    %c0_i32 = arith.constant 0 : i32
    %c0_i32_0 = arith.constant 0 : i32
    %c0_i32_1 = arith.constant 0 : i32
    return %arg0, %c0_i32, %c0_i32_0 : i32, i32, i32
  }
  func.func @transform_4(%arg0: i32, %arg1: i32) -> (i32, i32) {
    %c0_i32 = arith.constant 0 : i32
    %c0_i32_0 = arith.constant 0 : i32
    %c0_i32_1 = arith.constant 0 : i32
    return %c0_i32, %c0_i32_0 : i32, i32
  }
  func.func @transform_5(%arg0: i32, %arg1: i32) -> (i32, i32) {
    %c0_i32 = arith.constant 0 : i32
    %c0_i32_0 = arith.constant 0 : i32
    %c0_i32_1 = arith.constant 0 : i32
    return %c0_i32, %c0_i32_0 : i32, i32
  }
  func.func @transform_6(%arg0: i32, %arg1: i32) -> (i32, i32, i32) {
    %c0_i32 = arith.constant 0 : i32
    %c0_i32_0 = arith.constant 0 : i32
    return %arg0, %arg1, %c0_i32 : i32, i32, i32
  }
  func.func @transform_7(%arg0: i32, %arg1: i32) -> (i32, i32, i32) {
    %c0_i32 = arith.constant 0 : i32
    %c0_i32_0 = arith.constant 0 : i32
    return %arg0, %arg1, %c0_i32 : i32, i32, i32
  }
}

</mosaic_0001>

<bundles_post_ra>
// kernel: align_feature_layer.1
= control target key start
LH: loop header
LB: loop body
LE: loop exit
PB: predicated region body
PF: predicated region fallthrough
CT: control target
= control target key end

     0   :  { %13 = vsyncpa [#allocation3], 0  ;;  %s1500_s0 = inlined_call_operand.vmem [shape: bf16[2,16,128], index: 0, kind: input, shape index: {}]   ;;  %s1501_s1 = inlined_call_operand.vmem [shape: bf16[2,128,128], index: 1, kind: input, shape index: {}]   ;;  %s1502_s2 = inlined_call_operand.vmem [shape: bf16[2,128,128], index: 2, kind: input, shape index: {}]   ;;  %s1503_s3 = inlined_call_operand.vmem [shape: s32[2,1,128], index: 3, kind: input, shape index: {}]   ;;  %s1504_s4 = inlined_call_operand.vmem [shape: bf16[128,128], index: 4, kind: input, shape index: {}]   ;;  %s1505_s5 = inlined_call_operand.vmem [shape: f32[1,128], index: 5, kind: input, shape index: {}]   ;;  %s1506_s6 = inlined_call_operand.hbm [shape: f32[2,16,128], index: 6, kind: output, shape index: {0}]   ;;  %s1507_s7 = inlined_call_operand.vmem [shape: f32[2,16,128], index: 7, kind: output, shape index: {1}]  }
   0x1   :  { %15 = vsyncpa [#allocation3 + $0x1], 0  ;;  %s1287_s24 = smov 0   ;;  %s1289_s25 = smov 0  }
   0x2   :  { %s1291_s26 = smov 0   ;;  %s1293_s27 = smov 0  }
   0x3   :  { %s1295_s28 = smov 0   ;;  %s1297_s29 = smov 0  }
   0x4 LB: > { %s931_s30 = sadd.s32 4294967295, %s1239_s29   ;;  %s932_s8 = sadd.s32 4294967294, %s1239_s29   ;;  %s1239_s29 = sphi %s1297_s29, %s21_s29   ;;  %s1235_s28 = sphi %s1295_s28, %s1514_s28   ;;  %s1231_s27 = sphi %s1293_s27, %s1513_s27   ;;  %s1227_s26 = sphi %s1291_s26, %s1512_s26   ;;  %s1223_s25 = sphi %s1289_s25, %s1511_s25   ;;  %s1219_s24 = sphi %s1287_s24, %s1510_s24  }
   0x5   : > { %s33_s9 = sadd.s32 1, %s1235_s28  ;;  %s190_s10 = sadd.s32 1, %s1227_s26 }
   0x6   : > { %p35_p0 = scmp.ge.s32.totalorder %s33_s9, 2  ;;  %p200_p1 = scmp.ne.s32.totalorder %s1227_s26, %s1223_s25 }
   0x7   : > { %p201_p2 = scmp.eq.s32.totalorder %s931_s30, 1  ;;  %p206_p3 = scmp.ne.s32.totalorder %s1223_s25, %s1219_s24 }
   0x8   : > { %s1516_s9 = smov (%p35_p0, %s33_s9), 0  ;;  %p207_p5 = scmp.eq.s32.totalorder %s932_s8, 1 }
   0x9   : > { %p1327_p4 = por %p201_p2, %p200_p1  ;;  %s185_s12 = ssub.s32 %s1235_s28, %s1516_s9 }
   0xa   : > { %p935_p6 = scmp.ge.s32.totalorder %s1239_s29, 1  ;;  %p188_p7 = scmp.eq.s32.totalorder %s185_s12, 0 }
   0xb   : > { %p1334_p8 = por %p207_p5, %p206_p3  ;;  %p294_p9 = scmp.lt.s32.totalorder %s1239_s29, 3 }
   0xc   : > { %s1340_s14 = scalar_select %p188_p7, %s1227_s26, %s190_s10  }
   0xd   : > { %p295_p10 = pnand %p935_p6, %p294_p9 }
   0xe   : > { %v1128_v0 = vld [vmem:[%s1504_s4] sm:$0xff] (!%p295_p10)   ;;  %v1241_v1 = vmov (!%p295_p10), 0.0   ;;  %v1129_v2 = vld [vmem:[%s1504_s4 + $0x8] sm:$0xff] (!%p295_p10)   ;;  %vm1242_vm0 = vmmov (!%p295_p10), 0   ;;  %p353_p11 = scmp.lt.s32.totalorder (!%p295_p10), %s1231_s27, 1  ;;  %v1130_v3 = vld [vmem:[%s1504_s4 + $0x10] sm:$0xff] (!%p295_p10)   ;;  %v618_v28 = vlaneseq (!%p295_p10) }
   0xf   : > { %298 = sbr.rel (%p295_p10) target bundleno = 1027 (0x403), region = 44  ;;  %1008 = vmatprep.subr.bf16.mxu0 (!%p295_p10), %v1241_v1  ;;  %1028 = vmatprep.subr.bf16.mxu1 (!%p295_p10), %v1241_v1  ;;  %v1131_v5 = vld [vmem:[%s1504_s4 + $0x18] sm:$0xff] (!%p295_p10)   ;;  %v1132_v7 = vld [vmem:[%s1504_s4 + $0x20] sm:$0xff] (!%p295_p10)   ;;  %v1133_v9 = vld [vmem:[%s1504_s4 + $0x28] sm:$0xff] (!%p295_p10)   ;;  %v1243_v32 = vmov (!%p295_p10), 0  }
  0x10   : > { %1009 = vmatpush3.bf16.msra.mxu0 (!%p295_p10), %v1128_v0  ;;  %1024 = vmatprep.mubr.msk.bf16.mxu0 (!%p295_p10), %vm1242_vm0, %v1241_v1  ;;  %v1134_v11 = vld [vmem:[%s1504_s4 + $0x30] sm:$0xff] (!%p295_p10)   ;;  %v1135_v13 = vld [vmem:[%s1504_s4 + $0x38] sm:$0xff] (!%p295_p10)   ;;  %v945_v18 = vld [vmem:[%s1505_s5] ss:$0 sm:$0xff] (!%p295_p10)  ;;  %v619_v30 = vshrl.u32 (!%p295_p10), %v618_v28, 7 }
  0x11   : > { %1010 = vmatprep.subr.bf16.mxu0 (!%p295_p10), %v1241_v1  ;;  %1044 = vmatprep.mubr.msk.bf16.mxu1 (!%p295_p10), %vm1242_vm0, %v1241_v1 }
  0x12   : > { %v620_v31 = vsub.s32 (!%p295_p10), 0, %v619_v30 }
  0x14   : > { %1011 = vmatpush3.bf16.msra.mxu0 (!%p295_p10), %v1129_v2 }
  0x15   : > { %1012 = vmatprep.subr.bf16.mxu0 (!%p295_p10), %v1241_v1 }
  0x16   : > { %s1357_s19 = scalar_select %p353_p11, %s1231_s27, 1 }
  0x18   : > { %s976_s22 = sshll.u32 %s1357_s19, 3  ;;  %s977_s10 = sshll.u32 %s1357_s19, 6  ;;  %1013 = vmatpush3.bf16.msra.mxu0 %v1130_v3 }
  0x19   : > { %s1367_s8 = scalar_lea.vmem %s1500_s0, %s976_s22  ;;  %s1373_s16 = scalar_lea.vmem %s1502_s2, %s977_s10  ;;  %1014 = vmatprep.subr.bf16.mxu0 %v1241_v1 }
  0x1a   : > { %v1137_v4 = vld [vmem:[%s1373_s16] sm:$0xff]   ;;  %v1138_v6 = vld [vmem:[%s1373_s16 + $0x8] sm:$0xff]   ;;  %s1389_s30 = scalar_lea.vmem %s1501_s1, %s977_s10  ;;  %v1139_v8 = vld [vmem:[%s1373_s16 + $0x10] sm:$0xff]   ;;  %s374_s12 = scalar_lea.vmem %s1503_s3, %s1357_s19 }
  0x1b   : > { %1029 = vmatpush3.bf16.msra.mxu1 %v1137_v4  ;;  %v1140_v10 = vld [vmem:[%s1373_s16 + $0x18] sm:$0xff]   ;;  %v1141_v12 = vld [vmem:[%s1373_s16 + $0x20] sm:$0xff]   ;;  %v1142_v14 = vld [vmem:[%s1373_s16 + $0x28] sm:$0xff]   ;;  %s980_s22 = sshll.u32 %s1231_s27, 8  ;;  %s1244_s27 = smov [#allocation2]  }
  0x1c   : > { %1030 = vmatprep.subr.bf16.mxu1 %v1241_v1  ;;  %1015 = vmatpush3.bf16.msra.mxu0 %v1131_v5  ;;  %v1136_v15 = vld [vmem:[%s1367_s8] sm:$0xff]   ;;  %v1143_v16 = vld [vmem:[%s1373_s16 + $0x30] sm:$0xff]   ;;  %v1144_v17 = vld [vmem:[%s1373_s16 + $0x38] sm:$0xff]   ;;  %s979_s16 = sshll.u32 %s1357_s19, 4  ;;  %s1452_s23 = scalar_lea.hbm %s1506_s6, %s980_s22 }
  0x1d   : > { %1016 = vmatprep.subr.bf16.mxu0 %v1241_v1  ;;  %v615_v29 = vld [vmem:[%s374_s12] sm:$0x1]  ;;  %v1146_v42 = vld [vmem:[%s1389_s30 + $0x8] sm:$0xff]   ;;  %v1147_v43 = vld [vmem:[%s1389_s30 + $0x10] sm:$0xff]   ;;  %s384_s17 = scalar_lea.vmem %s1507_s7, %s979_s16  ;;  %s1165_s15 = sshll.u32 %s1244_s27, 4  ;;  %s1166_s15 = int_to_ptr.vmem [resolvable:$false] %s1165_s15 }
  0x1e   : > { %vm616_vm1 = vcmp.ne.s32.totalorder %v615_v29, 0  ;;  %v1145_v41 = vld [vmem:[%s1389_s30] sm:$0xff]   ;;  %v1148_v52 = vld [vmem:[%s1389_s30 + $0x18] sm:$0xff]   ;;  %v1150_v54 = vld [vmem:[%s1389_s30 + $0x28] sm:$0xff]   ;;  %s1167_s10 = scalar_lea.vmem %s1166_s15, 512 }
  0x1f   : > { %1031 = vmatpush3.bf16.msra.mxu1 %v1138_v6  ;;  %v617_v33 = vsel %vm616_vm1, 1, %v1243_v32  ;;  %v1149_v53 = vld [vmem:[%s1389_s30 + $0x20] sm:$0xff]   ;;  %v1151_v55 = vld [vmem:[%s1389_s30 + $0x30] sm:$0xff]   ;;  %v1152_v56 = vld [vmem:[%s1389_s30 + $0x38] sm:$0xff]   ;;  %s338_s30 = sand.u32 1, %s1223_s25  }
  0x20   : > { %1032 = vmatprep.subr.bf16.mxu1 %v1241_v1  ;;  %1017 = vmatpush3.bf16.msra.mxu0 %v1132_v7  ;;  %v621_v34 = vrot.slane %v617_v33, %v620_v31  ;;  %s936_s18 = sshll.u32 %s338_s30, 4  ;;  %s1454_s12 = scalar_lea.sflag [#allocation3], %s338_s30 }
  0x21   : > { %1018 = vmatprep.subr.bf16.mxu0 %v1241_v1  ;;  %s340_s20 = scalar_lea.vmem [#allocation2], %s936_s18 }
  0x22   : > { %vm622_vm2 = vcmp.eq.s32.totalorder %v621_v34, 1  ;;  %s778_s21 = sshll.u32 %s340_s20, 4  ;;  %s1447_s21 = int_to_ptr.vmem [resolvable:$true] %s778_s21 }
  0x23   : > { %1033 = vmatpush3.bf16.msra.mxu1 %v1139_v8  ;;  %s1161_s16 = scalar_lea.vmem %s1447_s21, 256  ;;  %p1168_p1 = scmp.lt.s32.totalorder %s1447_s21, %s1166_s15 }
  0x24   : > { %1034 = vmatprep.subr.bf16.mxu1 %v1241_v1  ;;  %1019 = vmatpush3.bf16.msra.mxu0 %v1133_v9  ;;  %p1162_p12 = scmp.ne.s32.totalorder %s1447_s21, %s1161_s16  ;;  %p1169_p2 = scmp.lt.s32.totalorder %s1167_s10, %s1161_s16 }
  0x25   : > { %1020 = vmatprep.subr.bf16.mxu0 %v1241_v1 }
  0x26   : > { %p1163_p13 = pnand %p1162_p12, %p1327_p4  ;;  %p1170_p3 = por %p1169_p2, %p1168_p1 }
  0x27   : > { %1035 = vmatpush3.bf16.msra.mxu1 %v1140_v10 }
  0x28   : > { %1036 = vmatprep.subr.bf16.mxu1 %v1241_v1  ;;  %1021 = vmatpush3.bf16.msra.mxu0 %v1134_v11  ;;  %p1164_p0 = pneg %p1163_p13 }
  0x29   : > { %1022 = vmatprep.subr.bf16.mxu0 %v1241_v1 }
  0x2a   : > { %p1171_p5 = pnand %p1170_p3, %p1164_p0 }
  0x2b   : > { %1037 = vmatpush3.bf16.msra.mxu1 %v1141_v12 }
  0x2c   : > { %1038 = vmatprep.subr.bf16.mxu1 %v1241_v1  ;;  %1023 = vmatpush3.bf16.msra.mxu0 %v1135_v13 }
  0x2d   : > { %1048 = vmatprep.subr.bf16.mxu0 %v1241_v1 }
  0x2f   : > { %1039 = vmatpush3.bf16.msra.mxu1 %v1142_v14  ;;  %1025 = vmatmul.mubr.bf16.vlgmr.msra.gmra.mrb[0].mxu0 %v1136_v15 }
  0x30   : > { %1040 = vmatprep.subr.bf16.mxu1 %v1241_v1  ;;  %1064 = vmatprep.mubr.msk.bf16.mxu0 %vm1242_vm0, %v1241_v1 }
  0x31   : > { %1049 = vmatpush3.bf16.msra.mxu0 %v1145_v41 }
  0x32   : > { %1050 = vmatprep.subr.bf16.mxu0 %v1241_v1 }
  0x33   : > { %1041 = vmatpush3.bf16.msra.mxu1 %v1143_v16 }
  0x34   : > { %1042 = vmatprep.subr.bf16.mxu1 %v1241_v1 }
  0x35   : > { %1051 = vmatpush3.bf16.msra.mxu0 %v1146_v42 }
  0x36   : > { %1052 = vmatprep.subr.bf16.mxu0 %v1241_v1 }
  0x37   : > { %1043 = vmatpush3.bf16.msra.mxu1 %v1144_v17 }
  0x39   : > { %1053 = vmatpush3.bf16.msra.mxu0 %v1147_v43 }
  0x3a   : > { %1054 = vmatprep.subr.bf16.mxu0 %v1241_v1 }
  0x3d   : > { %1055 = vmatpush3.bf16.msra.mxu0 %v1148_v52 }
  0x3e   : > { %1056 = vmatprep.subr.bf16.mxu0 %v1241_v1 }
  0x41   : > { %1057 = vmatpush3.bf16.msra.mxu0 %v1149_v53 }
  0x42   : > { %1058 = vmatprep.subr.bf16.mxu0 %v1241_v1 }
  0x45   : > { %1059 = vmatpush3.bf16.msra.mxu0 %v1150_v54 }
  0x46   : > { %1060 = vmatprep.subr.bf16.mxu0 %v1241_v1 }
  0x49   : > { %1061 = vmatpush3.bf16.msra.mxu0 %v1151_v55 }
  0x4a   : > { %1062 = vmatprep.subr.bf16.mxu0 %v1241_v1 }
  0x4d   : > { %1063 = vmatpush3.bf16.msra.mxu0 %v1152_v56 }
 0x102   : > { %v500_v19 = vpop.f32.mrb[0].mxu0 }
 0x103   : > { %v501_v20 = vadd.f32 %v945_v18, %v500_v19  ;;  %v1026_v21 = vpop.f32.mrb[1].mxu0 }
 0x104   : > { %v503_v22 = vpop.f32.mrb[2].mxu0 }
 0x105   : > { %v504_v23 = vadd.f32 %v945_v18, %v503_v22  ;;  %v1027_v24 = vpop.f32.mrb[3].mxu0  ;;  %v507_v25 = vmax.f32 %v501_v20, 0.0 }
 0x107   : > { %v508_v26 = vmax.f32 %v504_v23, 0.0 }
 0x109   : > { %v509_v27 = vpack.c.bf16 %v508_v26, %v507_v25 }
 0x10b   : > { %1045 = vmatmul.mubr.bf16.vlgmr.msra.gmra.mrb[0].mxu1 %v509_v27 }
 0x1de   : > { %v608_v35 = vpop.f32.mrb[0].mxu1 }
 0x1df   : > { %v1046_v36 = vpop.f32.mrb[1].mxu1  ;;  %v623_v37 = vsel %vm622_vm2, -inf, %v608_v35 }
 0x1e0   : > { %625 = vmax.xlane.f32.xlu0 %v623_v37  ;;  %v611_v38 = vpop.f32.mrb[2].mxu1 }
 0x1e1   : > { %v1047_v39 = vpop.f32.mrb[3].mxu1  ;;  %v624_v40 = vsel %vm622_vm2, -inf, %v611_v38 }
 0x1e4   : > { %627 = vmax.xlane.f32.xlu0 %v624_v40 }
 0x26d   : > { %v626_v44 = vpop.xlane.xlu0 %625 }
 0x26e   : > { %v629_v45 = vsub.f32 %v623_v37, %v626_v44 }
 0x270   : > { %v631_v46 = vmul.f32 1.442695, %v629_v45 }
 0x271   : > { %v628_v47 = vpop.xlane.xlu0 %627 }
 0x272   : > { %1153 = vpow2.f32 %v631_v46  ;;  %v630_v48 = vsub.f32 %v624_v40, %v628_v47 }
 0x274   : > { %v633_v49 = vmul.f32 1.442695, %v630_v48 }
 0x276   : > { %1155 = vpow2.f32 %v633_v49 }
 0x27c   : > { %v1154_v50 = vpop.eup %1153 }
 0x27d   : > { %635 = vadd.xlane.f32.xlu1 %v1154_v50 }
 0x280   : > { %v1156_v51 = vpop.eup %1155 }
 0x281   : > { %637 = vadd.xlane.f32.xlu1 %v1156_v51 }
 0x30a   : > { %v636_v57 = vpop.xlane.xlu1 %635 }
 0x30b   : > { %1157 = vrcp.f32 %v636_v57 }
 0x30e   : > { %v638_v58 = vpop.xlane.xlu1 %637 }
 0x30f   : > { %1159 = vrcp.f32 %v638_v58 }
 0x315   : > { %v1158_v59 = vpop.eup %1157 }
 0x316   : > { %v641_v60 = vmul.f32 %v1158_v59, %v1154_v50 }
 0x318   : > { %749 = vst [vmem:[%s384_s17] sm:$0xff] %v641_v60 }
 0x319   : > { %v1160_v61 = vpop.eup %1159 }
 0x31a   : > { %v642_v62 = vmul.f32 %v1160_v61, %v1156_v51 }
 0x31c   : > { %v643_v63 = vpack.c.bf16 %v642_v62, %v641_v60  ;;  %750 = vst [vmem:[%s384_s17 + $0x8] sm:$0xff] %v642_v62 }
 0x31e   : > { %1065 = vmatmul.mubr.bf16.vlgmr.msra.gmra.mrb[4].mxu0 %v643_v63 }
 0x3f1   : > { %v742_v0 = vpop.f32.mrb[4].mxu0 }
 0x3f2   : > { %751 = vst [vmem:[%s340_s20] sm:$0xff] %v742_v0  ;;  %v1066_v1 = vpop.f32.mrb[5].mxu0 }
 0x3f3   : > { %v745_v2 = vpop.f32.mrb[6].mxu0 }
 0x3f4   : > { %752 = vst [vmem:[%s340_s20 + $0x8] sm:$0xff] %v745_v2  ;;  %v1067_v3 = vpop.f32.mrb[7].mxu0 }
 0x3f5   : > { %1174 = shalt.err (!%p1171_p5)
}
 0x3f6   : > { %s1175_s17 = scalar_lea.hbm %s1452_s23, 256  ;;  %s1179_s20 = scalar_lea.hbm %s1506_s6, 512 }
 0x3f7   : > { %p1176_p6 = scmp.ne.s32.totalorder %s1452_s23, %s1175_s17  ;;  %p1180_p10 = scmp.lt.u32.totalorder %s1452_s23, %s1506_s6 }
 0x3f8   : > { %p1181_p11 = scmp.lt.u32.totalorder %s1179_s20, %s1175_s17  ;;  %p1183_p13 = scmp.lt.u32.totalorder %s1175_s17, %s1452_s23 }
 0x3f9   : > { %p1177_p7 = pnand %p1176_p6, %p1327_p4 }
 0x3fa   : > { %p1182_p12 = por %p1181_p11, %p1180_p10 }
 0x3fb   : > { %p1178_p9 = pneg %p1177_p7 }
 0x3fc   : > { %p1184_p0 = por %p1183_p13, %p1182_p12 }
 0x3fe   : > { %p1185_p1 = pnand %p1184_p0, %p1178_p9 }
 0x400   : > { %1188 = shalt.err (!%p1185_p1)
}
 0x401   : > { %s1245_s8 = smov 128   ;;  %s1246_s16 = smov 8  }
 0x402   : > { %1068 = dma.vmem_to_hbm [thread:$0]  (%p1327_p4), %s1447_s21, 256, %s1452_s23, %s1454_s12, %s1245_s8, %s1245_s8, %s1246_s16  }
 0x403 PF: > { %p1074_p2 = scmp.ge.s32.totalorder %s1239_s29, 2  ;;  %s797_s27 = sand.u32 1, %s1219_s24  }
 0x404   : > { %s798_s15 = scalar_lea.sflag [#allocation3], %s797_s27 }
 0x405   : > { %p1071_p3 = pnand %p1074_p2, %p1334_p8 }
 0x407   : > { %1214 = dma.done.wait (!%p1071_p3), %s798_s15, 256  }
 0x408   : > { %1216 = vsyncadd (!%p1071_p3), %s798_s15, 4294967040  ;;  %s21_s29 = sadd.s32 1, %s1239_s29   ;;  %s1510_s24 = smov %s1223_s25 }
 0x409   : > { %p18_p5 = scmp.ge.s32.totalorder %s21_s29, 4   ;;  %s1511_s25 = smov %s1227_s26 }
 0x40a   : > { %s1512_s26 = smov %s1340_s14  ;;  %s1513_s27 = smov %s1235_s28 }
 0x40b   : > { %s1514_s28 = smov %s1516_s9  ;;  %20 = sbr.rel (!%p18_p5) target bundleno = 4 (0x4), region = 100 }
 0x412   :  { %815 = vsyncpa [#allocation3], 1 }
 0x413   :  { %817 = vsyncpa [#allocation3 + $0x1], 1 }

</bundles_post_ra>
